<compile_context>
chip_gen: v6e
topology: v6e:2x2x1
jax: 0.10.0
libtpu: 0.0.40
codegen_flags: <defaults>
</compile_context>

<pallas_src>
from functools import partial

import jax
import jax.numpy as jnp
from jax.experimental import pallas as pl
from jax.experimental.pallas import tpu as pltpu

# Set to jnp.bfloat16 on v6e/v7x for ~2x MXU throughput (weights are pre-cast in the
# wrappers, activations cast in-kernel).  h/c state, h@W_hh, gate nonlinearities and all
# accumulations stay fp32 so the recurrence does not compound bf16 error.
MATMUL_DTYPE = jnp.float32


# ------------------------------- tiling helpers -------------------------------
def _batch_tile(b):
    # BlockSpec last-two-dims rule: the batch tile must equal B or be a multiple of 8.
    return 8 if (b > 8 and b % 8 == 0) else b


def _time_tile(s, b, row_cap=512):
    # Largest divisor TS of S such that the (TS*B, .) block obeys the last-two-dims rule.
    cap = max(1, min(s, row_cap // max(b, 1)))
    for ts in range(cap, 0, -1):
        if s % ts == 0 and (ts == s or (ts * b) % 8 == 0):
            return ts
    return s


def _fc_time_tile(s, b, hd, row_cap=2048):
    cap = max(1, min(s, row_cap // max(b, 1)))
    for tt in range(cap, 0, -1):
        if s % tt == 0 and (tt == s or ((tt * b) % 8 == 0 and (tt * hd) % 8 == 0)):
            return tt
    return s


# -------- Conv1d(k=3, p=1) + ReLU + MaxPool1d(k=3, s=1, p=1), time-major output --------
def _conv_relu_pool_kernel(x_ref, t_ref, w_ref, b_ref, o_ref, ps_ref, *,
                           seq_len, batch_tile):
    # x_ref: (TB*S, Cin) rows in (batch, time) order; t_ref: (TB*S, 1) per-row time index
    # w_ref: (3, Cin, Cout); b_ref: (1, Cout)
    # o_ref: (S, TB, Cout) time-major output block; ps_ref: (TB*S, Cout) fp32 staging scratch
    S, TB = seq_len, batch_tile
    x = x_ref[...].astype(MATMUL_DTYPE)
    t = t_ref[...]
    first = t == 0
    last = t == S - 1

    # k=3 halo via roll + edge masks (zero padding); batch boundaries handled by the masks.
    x_prev = jnp.where(first, 0.0, jnp.roll(x, 1, axis=0))
    x_next = jnp.where(last, 0.0, jnp.roll(x, -1, axis=0))
    acc = jnp.dot(x_prev, w_ref[0], preferred_element_type=jnp.float32)
    acc = acc + jnp.dot(x, w_ref[1], preferred_element_type=jnp.float32)
    acc = acc + jnp.dot(x_next, w_ref[2], preferred_element_type=jnp.float32)
    y = jnp.maximum(acc + b_ref[...], 0.0)                     # conv bias + ReLU

    # MaxPool1d(k=3, s=1, p=1): y >= 0 and the centre tap is always in the window, so
    # zero edge padding is equivalent to PyTorch's -inf padding.
    y_prev = jnp.where(first, 0.0, jnp.roll(y, 1, axis=0))
    y_next = jnp.where(last, 0.0, jnp.roll(y, -1, axis=0))
    ps_ref[...] = jnp.maximum(jnp.maximum(y_prev, y), y_next)  # (TB*S, Cout), (b,t) order

    # Emit time-major: output row (t, b) <- staged row b*S + t (in-kernel layout fixup; no
    # wrapper-side HBM transpose pass).
    @pl.loop(0, S)
    def _(s):
        rows = [ps_ref[pl.ds(b * S + s, 1), :] for b in range(TB)]
        tile = rows[0] if TB == 1 else jnp.concatenate(rows, axis=0)
        o_ref[s] = tile.astype(o_ref.dtype)


def conv_relu_pool(x, w, b):
    # x: (B, S, Cin); PyTorch Conv1d weight w: (Cout, Cin, 3), bias b: (Cout,)
    # Returns the time-major (S, B, Cout) activation (NCW permutes + transpose folded in).
    B, S, Cin = x.shape
    Cout = w.shape[0]
    w_t = jnp.transpose(w, (2, 1, 0)).astype(MATMUL_DTYPE)     # (3, Cin, Cout)
    b2 = b.reshape(1, Cout).astype(jnp.float32)
    TB = _batch_tile(B)
    nb = B // TB
    x2 = x.reshape(B * S, Cin)                                 # free merge of leading dims
    t_idx = jnp.tile(jnp.arange(S, dtype=jnp.int32), B).reshape(B * S, 1)
    return pl.pallas_call(
        partial(_conv_relu_pool_kernel, seq_len=S, batch_tile=TB),
        out_shape=jax.ShapeDtypeStruct((S, B, Cout), x.dtype),
        grid=(nb,),
        in_specs=[pl.BlockSpec((TB * S, Cin), lambda i: (i, 0)),
                  pl.BlockSpec((TB * S, 1), lambda i: (i, 0)),
                  pl.BlockSpec((3, Cin, Cout), lambda i: (0, 0, 0)),
                  pl.BlockSpec((1, Cout), lambda i: (0, 0))],
        out_specs=pl.BlockSpec((S, TB, Cout), lambda i: (0, i, 0)),
        scratch_shapes=[pltpu.VMEM((TB * S, Cout), jnp.float32)],
        compiler_params=pltpu.CompilerParams(dimension_semantics=("parallel",)),
    )(x2, t_idx, w_t, b2)


# -------------------------------- single LSTM layer ---------------------------------
def _lstm_kernel(x_ref, wih_ref, whh_ref, b_ref, o_ref, h_ref, c_ref, xp_ref, *,
                 reverse, time_tile, batch):
    # x_ref:  (TS*B, Cin) time-major rows (t, b) for this time chunk
    # wih_ref: (Cin, 4H), whh_ref: (H, 4H), b_ref: (1, 4H) -- gate columns in (i, f, o, g)
    #          order, bias = b_ih + b_hh
    # o_ref:  (TS*B, H) time-major hidden states
    # h_ref, c_ref: (B, H) fp32 recurrent state carried across the time-chunk grid axis
    # xp_ref: (TS*B, 4H) fp32 scratch holding the hoisted input projection
    TS, B = time_tile, batch
    H = h_ref.shape[1]

    @pl.when(pl.program_id(0) == 0)                  # first processed chunk
    def _():
        h_ref[...] = jnp.zeros_like(h_ref)
        c_ref[...] = jnp.zeros_like(c_ref)

    # Hoisted input projection: one (TS*B, Cin) x (Cin, 4H) MXU matmul per chunk (bias fused).
    xp_ref[...] = jnp.dot(x_ref[...].astype(MATMUL_DTYPE), wih_ref[...],
                          preferred_element_type=jnp.float32) + b_ref[...]

    whh = whh_ref[...]                               # recurrent weights stay fp32

    @pl.loop(0, TS)
    def _(step):
        t = (TS - 1 - step) if reverse else step     # backward direction folded in-kernel
        h = h_ref[...]
        c = c_ref[...]
        gates = xp_ref[pl.ds(t * B, B), :] + jnp.dot(
            h, whh, preferred_element_type=jnp.float32)
        sig = jax.nn.sigmoid(gates[:, :3 * H])       # i, f, o in one sigmoid
        g_g = jnp.tanh(gates[:, 3 * H:])             # g in one tanh
        i_g = sig[:, :H]
        f_g = sig[:, H:2 * H]
        o_g = sig[:, 2 * H:3 * H]
        c_new = f_g * c + i_g * g_g
        h_new = o_g * jnp.tanh(c_new)
        c_ref[...] = c_new
        h_ref[...] = h_new
        o_ref[pl.ds(t * B, B), :] = h_new.astype(o_ref.dtype)


def _permute_gate_cols(a):
    # PyTorch gate order (i, f, g, o) -> (i, f, o, g) along the last axis.
    h = a.shape[-1] // 4
    return jnp.concatenate([a[..., :2 * h], a[..., 3 * h:], a[..., 2 * h:3 * h]], axis=-1)


def lstm_layer(x_tm, w_ih, w_hh, b_ih, b_hh, reverse=False):
    # x_tm: (S, B, Cin) time-major; PyTorch weights w_ih (4H, Cin), w_hh (4H, H), biases (4H,)
    # Returns the time-major (S, B, H) hidden states for this direction.
    S, B, Cin = x_tm.shape
    H = w_hh.shape[1]
    wih = _permute_gate_cols(w_ih.T).astype(MATMUL_DTYPE)            # (Cin, 4H)
    whh = _permute_gate_cols(w_hh.T).astype(jnp.float32)             # (H, 4H)
    bias = _permute_gate_cols((b_ih + b_hh).reshape(1, 4 * H)).astype(jnp.float32)

    TS = _time_tile(S, B)
    ns = S // TS
    tmap = (lambda si: (ns - 1 - si, 0)) if reverse else (lambda si: (si, 0))

    x2 = x_tm.reshape(S * B, Cin)                    # free merge of leading dims (time-major)
    out = pl.pallas_call(
        partial(_lstm_kernel, reverse=reverse, time_tile=TS, batch=B),
        out_shape=jax.ShapeDtypeStruct((S * B, H), x_tm.dtype),
        grid=(ns,),
        in_specs=[pl.BlockSpec((TS * B, Cin), tmap),
                  pl.BlockSpec((Cin, 4 * H), lambda si: (0, 0)),
                  pl.BlockSpec((H, 4 * H), lambda si: (0, 0)),
                  pl.BlockSpec((1, 4 * H), lambda si: (0, 0))],
        out_specs=pl.BlockSpec((TS * B, H), tmap),
        scratch_shapes=[pltpu.VMEM((B, H), jnp.float32),
                        pltpu.VMEM((B, H), jnp.float32),
                        pltpu.VMEM((TS * B, 4 * H), jnp.float32)],
        compiler_params=pltpu.CompilerParams(dimension_semantics=("arbitrary",)),
    )(x2, wih, whh, bias)
    return out.reshape(S, B, H)                      # free split of leading dims


# ------------------- fc1 + ReLU + Dropout(eval) + fc2 fused head --------------------
def _fc_head_kernel(h_ref, w1_ref, b1_ref, w2_ref, b2_ref, o_ref, acc_ref, *,
                    time_tile, batch, hidden):
    # h_ref:  (TT*B, Hd) time-major rows of the LSTM output for this time chunk
    # w1_ref: (TT*Hd, F1) matching rows of fc1 weight (transposed); b1_ref: (1, F1)
    # w2_ref: (F1, F2); b2_ref: (1, F2); o_ref: (B, F2); acc_ref: (B, F1) fp32 accumulator
    k = pl.program_id(0)

    @pl.when(k == 0)
    def _():
        acc_ref[...] = jnp.zeros_like(acc_ref)

    part = jnp.zeros(acc_ref.shape, jnp.float32)
    for tt in range(time_tile):                      # static unroll over the chunk timesteps
        lhs = h_ref[tt * batch:(tt + 1) * batch, :].astype(MATMUL_DTYPE)
        rhs = w1_ref[tt * hidden:(tt + 1) * hidden, :]
        part = part + jnp.dot(lhs, rhs, preferred_element_type=jnp.float32)
    acc_ref[...] += part

    @pl.when(k == pl.num_programs(0) - 1)
    def _():
        hid = jnp.maximum(acc_ref[...] + b1_ref[...], 0.0)     # fc1 bias + ReLU
        # nn.Dropout is the identity at inference time (module in eval mode) -> no-op.
        out = jnp.dot(hid.astype(MATMUL_DTYPE), w2_ref[...],
                      preferred_element_type=jnp.float32) + b2_ref[...]
        o_ref[...] = out.astype(o_ref.dtype)


def fc_head(h_tm, w1, b1, w2, b2):
    # h_tm: (S, B, Hd) time-major LSTM output.  PyTorch fc1: (F1, S*Hd), fc2: (F2, F1).
    # Computes fc2(dropout(relu(fc1(outputs.reshape(B, S*Hd))))) with the flatten/transpose
    # folded into the K-tiling over time.
    S, B, Hd = h_tm.shape
    F1, F2 = w1.shape[0], w2.shape[0]
    assert w1.shape[1] == S * Hd
    w1t = w1.T.astype(MATMUL_DTYPE)                  # (S*Hd, F1); row t*Hd+j <-> (t, j)
    w2t = w2.T.astype(MATMUL_DTYPE)                  # (F1, F2)
    TT = _fc_time_tile(S, B, Hd)
    nk = S // TT
    h2 = h_tm.reshape(S * B, Hd)                     # free merge of leading dims
    return pl.pallas_call(
        partial(_fc_head_kernel, time_tile=TT, batch=B, hidden=Hd),
        out_shape=jax.ShapeDtypeStruct((B, F2), h_tm.dtype),
        grid=(nk,),
        in_specs=[pl.BlockSpec((TT * B, Hd), lambda k: (k, 0)),
                  pl.BlockSpec((TT * Hd, F1), lambda k: (k, 0)),
                  pl.BlockSpec((1, F1), lambda k: (0, 0)),
                  pl.BlockSpec((F1, F2), lambda k: (0, 0)),
                  pl.BlockSpec((1, F2), lambda k: (0, 0))],
        out_specs=pl.BlockSpec((B, F2), lambda k: (0, 0)),
        scratch_shapes=[pltpu.VMEM((B, F1), jnp.float32)],
        compiler_params=pltpu.CompilerParams(dimension_semantics=("arbitrary",)),
    )(h2, w1t, b1.reshape(1, F1).astype(jnp.float32), w2t,
      b2.reshape(1, F2).astype(jnp.float32))


# ------------------------------- parameters / forward --------------------------------
def init_params(key, input_size, output_channel, hidden_size, num_layers,
                output_size, bidirectional, seq_len):
    ks = jax.random.split(key, 64)
    glorot = jax.nn.initializers.glorot_normal()
    he_u = jax.nn.initializers.he_uniform()
    he_n = jax.nn.initializers.he_normal()
    ortho = jax.nn.initializers.orthogonal()
    params = {}
    # Conv1d: kaiming_uniform weight, zero bias
    params["conv_w"] = he_u(ks[0], (output_channel, input_size, 3), jnp.float32)
    params["conv_b"] = jnp.zeros((output_channel,), jnp.float32)
    dirs = 2 if bidirectional else 1
    kidx = 1
    lstm = []
    for layer in range(num_layers):
        in_sz = output_channel if layer == 0 else hidden_size * dirs
        layer_p = []
        for _ in range(dirs):
            w_ih = he_n(ks[kidx], (4 * hidden_size, in_sz), jnp.float32); kidx += 1
            w_hh = ortho(ks[kidx], (4 * hidden_size, hidden_size), jnp.float32); kidx += 1
            b_ih = jnp.ones((4 * hidden_size,), jnp.float32)   # nn.init.constant_(bias, 1)
            b_hh = jnp.ones((4 * hidden_size,), jnp.float32)
            layer_p.append((w_ih, w_hh, b_ih, b_hh))
        lstm.append(layer_p)
    params["lstm"] = lstm
    h_eff = hidden_size * dirs
    params["fc1_w"] = glorot(ks[kidx], (h_eff, h_eff * seq_len), jnp.float32); kidx += 1
    params["fc1_b"] = jnp.zeros((h_eff,), jnp.float32)
    params["fc2_w"] = glorot(ks[kidx], (output_size, h_eff), jnp.float32); kidx += 1
    params["fc2_b"] = jnp.zeros((output_size,), jnp.float32)
    return params


def cnn_lstm_forward(x, params):
    # conv -> relu -> maxpool, emitted time-major (S, B, Cout)
    h_tm = conv_relu_pool(x, params["conv_w"], params["conv_b"])
    for layer_p in params["lstm"]:
        outs = [lstm_layer(h_tm, w_ih, w_hh, b_ih, b_hh, reverse=(d == 1))
                for d, (w_ih, w_hh, b_ih, b_hh) in enumerate(layer_p)]
        h_tm = outs[0] if len(outs) == 1 else jnp.concatenate(outs, axis=-1)
    # fc1 + ReLU + Dropout(eval: identity) + fc2, fused; consumes time-major output directly.
    return fc_head(h_tm, params["fc1_w"], params["fc1_b"],
                   params["fc2_w"], params["fc2_b"])


# -------------------------------- pure-JAX reference ---------------------------------
def reference_forward(x, params):
    w, b = params["conv_w"], params["conv_b"]
    S = x.shape[1]
    xc = jnp.transpose(x, (0, 2, 1))                            # (B, Cin, S)
    xp = jnp.pad(xc, ((0, 0), (0, 0), (1, 1)))
    y = sum(jnp.einsum("bcs,oc->bos", xp[:, :, k:k + S], w[:, :, k]) for k in range(3))
    y = jnp.maximum(y + b[None, :, None], 0.0)
    yp = jnp.pad(y, ((0, 0), (0, 0), (1, 1)), constant_values=-jnp.inf)
    y = jnp.maximum(jnp.maximum(yp[:, :, 0:S], yp[:, :, 1:S + 1]), yp[:, :, 2:S + 2])
    cur = jnp.transpose(y, (0, 2, 1))                           # (B, S, Cout)

    def run_lstm(xx, w_ih, w_hh, b_ih, b_hh):
        Bx, Sx, _ = xx.shape
        H = w_hh.shape[1]
        h = jnp.zeros((Bx, H), jnp.float32)
        c = jnp.zeros((Bx, H), jnp.float32)
        outs = []
        for t in range(Sx):
            g = xx[:, t, :] @ w_ih.T + h @ w_hh.T + b_ih + b_hh
            i = jax.nn.sigmoid(g[:, :H]); f = jax.nn.sigmoid(g[:, H:2 * H])
            gg = jnp.tanh(g[:, 2 * H:3 * H]); o = jax.nn.sigmoid(g[:, 3 * H:])
            c = f * c + i * gg
            h = o * jnp.tanh(c)
            outs.append(h)
        return jnp.stack(outs, axis=1)

    for layer_p in params["lstm"]:
        outs = []
        for d, (w_ih, w_hh, b_ih, b_hh) in enumerate(layer_p):
            xx = jnp.flip(cur, axis=1) if d == 1 else cur
            o = run_lstm(xx, w_ih, w_hh, b_ih, b_hh)
            if d == 1:
                o = jnp.flip(o, axis=1)
            outs.append(o)
        cur = outs[0] if len(outs) == 1 else jnp.concatenate(outs, axis=-1)
    out = cur.reshape(cur.shape[0], -1)
    out = jnp.maximum(out @ params["fc1_w"].T + params["fc1_b"], 0.0)
    return out @ params["fc2_w"].T + params["fc2_b"]


if __name__ == "__main__":
    # small shapes consistent with the module's forward
    B, S, Cin = 2, 8, 4            # batch, seq_len, input_size
    Cout, H = 8, 32                # output_channel, hidden_size
    num_layers, out_size = 1, 3
    bidirectional = False

    key = jax.random.PRNGKey(0)
    kx, kp = jax.random.split(key)
    x = jax.random.normal(kx, (B, S, Cin), jnp.float32)
    params = init_params(kp, Cin, Cout, H, num_layers, out_size, bidirectional, S)

    out = jax.jit(cnn_lstm_forward)(x, params)
    out = jax.block_until_ready(out)

    ref = reference_forward(x, params)
    assert out.shape == (B, out_size), out.shape
    assert jnp.allclose(out, ref, atol=1e-2, rtol=1e-2), (out, ref)
    print("KERNEL_OK")
</pallas_src>

<mosaic_0001>
module attributes {stable_mosaic.version = 11 : i64} {
  func.func @_conv_relu_pool_kernel(%arg0: i32, %arg1: memref<16x4xf32, #tpu.memory_space<vmem>>, %arg2: memref<16x1xi32, #tpu.memory_space<vmem>>, %arg3: memref<3x4x8xf32, #tpu.memory_space<vmem>>, %arg4: memref<1x8xf32, #tpu.memory_space<vmem>>, %arg5: memref<8x2x8xf32, #tpu.memory_space<vmem>>, %arg6: memref<16x8xf32, #tpu.memory_space<vmem>>) attributes {dimension_semantics = [#tpu.dimension_semantics<parallel>], iteration_bounds = array<i64: 1>, scalar_prefetch = 0 : i64, scratch_operands = 1 : i64, tpu.core_type = #tpu.core_type<tc>, window_params = [{transform_indices = @transform_0, window_bounds = array<i64: 16, 4>}, {transform_indices = @transform_1, window_bounds = array<i64: 16, 1>}, {pipeline_mode = #tpu.pipeline_mode<synchronous>, transform_indices = @transform_2, window_bounds = array<i64: 3, 4, 8>}, {pipeline_mode = #tpu.pipeline_mode<synchronous>, transform_indices = @transform_3, window_bounds = array<i64: 1, 8>}, {transform_indices = @transform_4, window_bounds = array<i64: 8, 2, 8>}]} {
    %c0 = arith.constant 0 : index
    %c0_0 = arith.constant 0 : index
    %0 = vector.load %arg1[%c0, %c0_0] : memref<16x4xf32, #tpu.memory_space<vmem>>, vector<16x4xf32>
    %c0_1 = arith.constant 0 : index
    %c0_2 = arith.constant 0 : index
    %1 = vector.load %arg2[%c0_1, %c0_2] : memref<16x1xi32, #tpu.memory_space<vmem>>, vector<16x1xi32>
    %c0_i32 = arith.constant 0 : i32
    %2 = vector.broadcast %c0_i32 : i32 to vector<16x1xi32>
    %3 = arith.cmpi eq, %1, %2 : vector<16x1xi32>
    %c7_i32 = arith.constant 7 : i32
    %4 = vector.broadcast %c7_i32 : i32 to vector<16x1xi32>
    %5 = arith.cmpi eq, %1, %4 : vector<16x1xi32>
    %6 = vector.extract_strided_slice %0 {offsets = [15, 0], sizes = [1, 4], strides = [1, 1]} : vector<16x4xf32> to vector<1x4xf32>
    %7 = vector.extract_strided_slice %0 {offsets = [0, 0], sizes = [15, 4], strides = [1, 1]} : vector<16x4xf32> to vector<15x4xf32>
    %8 = tpu.concatenate %6, %7 in 0 : vector<1x4xf32>, vector<15x4xf32> -> vector<16x4xf32>
    %cst = arith.constant 0.000000e+00 : f32
    %9 = vector.shape_cast %3 : vector<16x1xi1> to vector<16x1xi1>
    %10 = vector.broadcast %9 : vector<16x1xi1> to vector<16x4xi1>
    %11 = vector.broadcast %cst : f32 to vector<16x4xf32>
    %12 = arith.select %10, %11, %8 : vector<16x4xi1>, vector<16x4xf32>
    %13 = vector.extract_strided_slice %0 {offsets = [1, 0], sizes = [15, 4], strides = [1, 1]} : vector<16x4xf32> to vector<15x4xf32>
    %14 = vector.extract_strided_slice %0 {offsets = [0, 0], sizes = [1, 4], strides = [1, 1]} : vector<16x4xf32> to vector<1x4xf32>
    %15 = tpu.concatenate %13, %14 in 0 : vector<15x4xf32>, vector<1x4xf32> -> vector<16x4xf32>
    %cst_3 = arith.constant 0.000000e+00 : f32
    %16 = vector.shape_cast %5 : vector<16x1xi1> to vector<16x1xi1>
    %17 = vector.broadcast %16 : vector<16x1xi1> to vector<16x4xi1>
    %18 = vector.broadcast %cst_3 : f32 to vector<16x4xf32>
    %19 = arith.select %17, %18, %15 : vector<16x4xi1>, vector<16x4xf32>
    %c0_4 = arith.constant 0 : index
    %c0_5 = arith.constant 0 : index
    %c0_6 = arith.constant 0 : index
    %20 = vector.load %arg3[%c0_4, %c0_5, %c0_6] : memref<3x4x8xf32, #tpu.memory_space<vmem>>, vector<1x4x8xf32>
    %21 = vector.shape_cast %20 : vector<1x4x8xf32> to vector<4x8xf32>
    %cst_7 = arith.constant dense<0.000000e+00> : vector<16x8xf32>
    %22 = tpu.matmul %12, %21, %cst_7 {dimension_numbers = #tpu.dot_dimension_numbers<[1], [0], [0], [1], [0, 0, 1, 1], [], []>} : vector<16x4xf32>, vector<4x8xf32>, vector<16x8xf32> -> vector<16x8xf32>
    %c1 = arith.constant 1 : index
    %c0_8 = arith.constant 0 : index
    %c0_9 = arith.constant 0 : index
    %23 = vector.load %arg3[%c1, %c0_8, %c0_9] : memref<3x4x8xf32, #tpu.memory_space<vmem>>, vector<1x4x8xf32>
    %24 = vector.shape_cast %23 : vector<1x4x8xf32> to vector<4x8xf32>
    %cst_10 = arith.constant dense<0.000000e+00> : vector<16x8xf32>
    %25 = tpu.matmul %0, %24, %cst_10 {dimension_numbers = #tpu.dot_dimension_numbers<[1], [0], [0], [1], [0, 0, 1, 1], [], []>} : vector<16x4xf32>, vector<4x8xf32>, vector<16x8xf32> -> vector<16x8xf32>
    %26 = arith.addf %22, %25 : vector<16x8xf32>
    %c2 = arith.constant 2 : index
    %c0_11 = arith.constant 0 : index
    %c0_12 = arith.constant 0 : index
    %27 = vector.load %arg3[%c2, %c0_11, %c0_12] : memref<3x4x8xf32, #tpu.memory_space<vmem>>, vector<1x4x8xf32>
    %28 = vector.shape_cast %27 : vector<1x4x8xf32> to vector<4x8xf32>
    %cst_13 = arith.constant dense<0.000000e+00> : vector<16x8xf32>
    %29 = tpu.matmul %19, %28, %cst_13 {dimension_numbers = #tpu.dot_dimension_numbers<[1], [0], [0], [1], [0, 0, 1, 1], [], []>} : vector<16x4xf32>, vector<4x8xf32>, vector<16x8xf32> -> vector<16x8xf32>
    %30 = arith.addf %26, %29 : vector<16x8xf32>
    %c0_14 = arith.constant 0 : index
    %c0_15 = arith.constant 0 : index
    %31 = vector.load %arg4[%c0_14, %c0_15] : memref<1x8xf32, #tpu.memory_space<vmem>>, vector<1x8xf32>
    %32 = vector.broadcast %31 : vector<1x8xf32> to vector<16x8xf32>
    %33 = arith.addf %30, %32 : vector<16x8xf32>
    %cst_16 = arith.constant 0.000000e+00 : f32
    %34 = vector.broadcast %cst_16 : f32 to vector<16x8xf32>
    %35 = arith.maximumf %33, %34 : vector<16x8xf32>
    %36 = vector.extract_strided_slice %35 {offsets = [15, 0], sizes = [1, 8], strides = [1, 1]} : vector<16x8xf32> to vector<1x8xf32>
    %37 = vector.extract_strided_slice %35 {offsets = [0, 0], sizes = [15, 8], strides = [1, 1]} : vector<16x8xf32> to vector<15x8xf32>
    %38 = tpu.concatenate %36, %37 in 0 : vector<1x8xf32>, vector<15x8xf32> -> vector<16x8xf32>
    %cst_17 = arith.constant 0.000000e+00 : f32
    %39 = vector.shape_cast %3 : vector<16x1xi1> to vector<16x1xi1>
    %40 = vector.broadcast %39 : vector<16x1xi1> to vector<16x8xi1>
    %41 = vector.broadcast %cst_17 : f32 to vector<16x8xf32>
    %42 = arith.select %40, %41, %38 : vector<16x8xi1>, vector<16x8xf32>
    %43 = vector.extract_strided_slice %35 {offsets = [1, 0], sizes = [15, 8], strides = [1, 1]} : vector<16x8xf32> to vector<15x8xf32>
    %44 = vector.extract_strided_slice %35 {offsets = [0, 0], sizes = [1, 8], strides = [1, 1]} : vector<16x8xf32> to vector<1x8xf32>
    %45 = tpu.concatenate %43, %44 in 0 : vector<15x8xf32>, vector<1x8xf32> -> vector<16x8xf32>
    %cst_18 = arith.constant 0.000000e+00 : f32
    %46 = vector.shape_cast %5 : vector<16x1xi1> to vector<16x1xi1>
    %47 = vector.broadcast %46 : vector<16x1xi1> to vector<16x8xi1>
    %48 = vector.broadcast %cst_18 : f32 to vector<16x8xf32>
    %49 = arith.select %47, %48, %45 : vector<16x8xi1>, vector<16x8xf32>
    %50 = arith.maximumf %42, %35 : vector<16x8xf32>
    %51 = arith.maximumf %50, %49 : vector<16x8xf32>
    %c0_19 = arith.constant 0 : index
    %c0_20 = arith.constant 0 : index
    %52 = vector.load %arg6[%c0_19, %c0_20] : memref<16x8xf32, #tpu.memory_space<vmem>>, vector<16x8xf32>
    tpu.vector_store %arg6[%c0_19, %c0_20], %51 {strides = array<i32>} : memref<16x8xf32, #tpu.memory_space<vmem>>, vector<16x8xf32>,
    %c0_i32_21 = arith.constant 0 : i32
    %c8_i32 = arith.constant 8 : i32
    %53 = arith.addi %c0_i32_21, %c8_i32 : i32
    %c1_i32 = arith.constant 1 : i32
    scf.for %arg7 = %c0_i32_21 to %53 step %c1_i32  : i32 {
      %c1_i32_23 = arith.constant 1 : i32
      %54 = arith.muli %arg7, %c1_i32_23 : i32
      %c0_i32_24 = arith.constant 0 : i32
      %55 = arith.addi %c0_i32_24, %54 : i32
      %c0_i32_25 = arith.constant 0 : i32
      %56 = arith.addi %c0_i32_25, %55 : i32
      %57 = arith.index_cast %56 : i32 to index
      %c0_26 = arith.constant 0 : index
      %58 = vector.load %arg6[%57, %c0_26] : memref<16x8xf32, #tpu.memory_space<vmem>>, vector<1x8xf32>
      %c8_i32_27 = arith.constant 8 : i32
      %59 = arith.addi %c8_i32_27, %55 : i32
      %60 = arith.index_cast %59 : i32 to index
      %c0_28 = arith.constant 0 : index
      %61 = vector.load %arg6[%60, %c0_28] : memref<16x8xf32, #tpu.memory_space<vmem>>, vector<1x8xf32>
      %62 = tpu.concatenate %58, %61 in 0 : vector<1x8xf32>, vector<1x8xf32> -> vector<2x8xf32>
      %63 = arith.index_cast %55 : i32 to index
      %c0_29 = arith.constant 0 : index
      %c0_30 = arith.constant 0 : index
      %64 = vector.load %arg5[%63, %c0_29, %c0_30] : memref<8x2x8xf32, #tpu.memory_space<vmem>>, vector<1x2x8xf32>
      %65 = vector.shape_cast %64 : vector<1x2x8xf32> to vector<2x8xf32>
      %66 = vector.shape_cast %62 : vector<2x8xf32> to vector<1x2x8xf32>
      tpu.vector_store %arg5[%63, %c0_29, %c0_30], %66 {strides = array<i32>} : memref<8x2x8xf32, #tpu.memory_space<vmem>>, vector<1x2x8xf32>,
    }
    %c8_i32_22 = arith.constant 8 : i32
    return
  }
  func.func @transform_0(%arg0: i32) -> (i32, i32) {
    %c0_i32 = arith.constant 0 : i32
    %c0_i32_0 = arith.constant 0 : i32
    return %arg0, %c0_i32 : i32, i32
  }
  func.func @transform_1(%arg0: i32) -> (i32, i32) {
    %c0_i32 = arith.constant 0 : i32
    %c0_i32_0 = arith.constant 0 : i32
    return %arg0, %c0_i32 : i32, i32
  }
  func.func @transform_2(%arg0: i32) -> (i32, i32, i32) {
    %c0_i32 = arith.constant 0 : i32
    %c0_i32_0 = arith.constant 0 : i32
    %c0_i32_1 = arith.constant 0 : i32
    %c0_i32_2 = arith.constant 0 : i32
    return %c0_i32, %c0_i32_0, %c0_i32_1 : i32, i32, i32
  }
  func.func @transform_3(%arg0: i32) -> (i32, i32) {
    %c0_i32 = arith.constant 0 : i32
    %c0_i32_0 = arith.constant 0 : i32
    %c0_i32_1 = arith.constant 0 : i32
    return %c0_i32, %c0_i32_0 : i32, i32
  }
  func.func @transform_4(%arg0: i32) -> (i32, i32, i32) {
    %c0_i32 = arith.constant 0 : i32
    %c0_i32_0 = arith.constant 0 : i32
    %c0_i32_1 = arith.constant 0 : i32
    return %c0_i32, %arg0, %c0_i32_0 : i32, i32, i32
  }
}

module attributes {stable_mosaic.version = 11 : i64} {
  func.func @_lstm_kernel(%arg0: i32, %arg1: memref<16x8xf32, #tpu.memory_space<vmem>>, %arg2: memref<8x128xf32, #tpu.memory_space<vmem>>, %arg3: memref<32x128xf32, #tpu.memory_space<vmem>>, %arg4: memref<1x128xf32, #tpu.memory_space<vmem>>, %arg5: memref<16x32xf32, #tpu.memory_space<vmem>>, %arg6: memref<2x32xf32, #tpu.memory_space<vmem>>, %arg7: memref<2x32xf32, #tpu.memory_space<vmem>>, %arg8: memref<16x128xf32, #tpu.memory_space<vmem>>) attributes {dimension_semantics = [#tpu.dimension_semantics<arbitrary>], iteration_bounds = array<i64: 1>, scalar_prefetch = 0 : i64, scratch_operands = 3 : i64, tpu.core_type = #tpu.core_type<tc>, window_params = [{transform_indices = @transform_0, window_bounds = array<i64: 16, 8>}, {pipeline_mode = #tpu.pipeline_mode<synchronous>, transform_indices = @transform_1, window_bounds = array<i64: 8, 128>}, {pipeline_mode = #tpu.pipeline_mode<synchronous>, transform_indices = @transform_2, window_bounds = array<i64: 32, 128>}, {pipeline_mode = #tpu.pipeline_mode<synchronous>, transform_indices = @transform_3, window_bounds = array<i64: 1, 128>}, {transform_indices = @transform_4, window_bounds = array<i64: 16, 32>}]} {
    %c0_i32 = arith.constant 0 : i32
    %0 = arith.cmpi eq, %arg0, %c0_i32 : i32
    %1 = arith.extui %0 : i1 to i32
    %c0_i32_0 = arith.constant 0 : i32
    %2 = arith.cmpi ne, %1, %c0_i32_0 : i32
    scf.if %2 {
      %cst_12 = arith.constant 0.000000e+00 : f32
      %12 = vector.broadcast %cst_12 : f32 to vector<2x32xf32>
      %c0_13 = arith.constant 0 : index
      %c0_14 = arith.constant 0 : index
      %13 = vector.load %arg6[%c0_13, %c0_14] : memref<2x32xf32, #tpu.memory_space<vmem>>, vector<2x32xf32>
      tpu.vector_store %arg6[%c0_13, %c0_14], %12 {strides = array<i32>} : memref<2x32xf32, #tpu.memory_space<vmem>>, vector<2x32xf32>,
      %cst_15 = arith.constant 0.000000e+00 : f32
      %14 = vector.broadcast %cst_15 : f32 to vector<2x32xf32>
      %c0_16 = arith.constant 0 : index
      %c0_17 = arith.constant 0 : index
      %15 = vector.load %arg7[%c0_16, %c0_17] : memref<2x32xf32, #tpu.memory_space<vmem>>, vector<2x32xf32>
      tpu.vector_store %arg7[%c0_16, %c0_17], %14 {strides = array<i32>} : memref<2x32xf32, #tpu.memory_space<vmem>>, vector<2x32xf32>,
    } else {
    }
    %c0 = arith.constant 0 : index
    %c0_1 = arith.constant 0 : index
    %3 = vector.load %arg1[%c0, %c0_1] : memref<16x8xf32, #tpu.memory_space<vmem>>, vector<16x8xf32>
    %c0_2 = arith.constant 0 : index
    %c0_3 = arith.constant 0 : index
    %4 = vector.load %arg2[%c0_2, %c0_3] : memref<8x128xf32, #tpu.memory_space<vmem>>, vector<8x128xf32>
    %cst = arith.constant dense<0.000000e+00> : vector<16x128xf32>
    %5 = tpu.matmul %3, %4, %cst {dimension_numbers = #tpu.dot_dimension_numbers<[1], [0], [0], [1], [0, 0, 1, 1], [], []>} : vector<16x8xf32>, vector<8x128xf32>, vector<16x128xf32> -> vector<16x128xf32>
    %c0_4 = arith.constant 0 : index
    %c0_5 = arith.constant 0 : index
    %6 = vector.load %arg4[%c0_4, %c0_5] : memref<1x128xf32, #tpu.memory_space<vmem>>, vector<1x128xf32>
    %7 = vector.broadcast %6 : vector<1x128xf32> to vector<16x128xf32>
    %8 = arith.addf %5, %7 : vector<16x128xf32>
    %c0_6 = arith.constant 0 : index
    %c0_7 = arith.constant 0 : index
    %9 = vector.load %arg8[%c0_6, %c0_7] : memref<16x128xf32, #tpu.memory_space<vmem>>, vector<16x128xf32>
    tpu.vector_store %arg8[%c0_6, %c0_7], %8 {strides = array<i32>} : memref<16x128xf32, #tpu.memory_space<vmem>>, vector<16x128xf32>,
    %c0_8 = arith.constant 0 : index
    %c0_9 = arith.constant 0 : index
    %10 = vector.load %arg3[%c0_8, %c0_9] : memref<32x128xf32, #tpu.memory_space<vmem>>, vector<32x128xf32>
    %c0_i32_10 = arith.constant 0 : i32
    %c8_i32 = arith.constant 8 : i32
    %11 = arith.addi %c0_i32_10, %c8_i32 : i32
    %c1_i32 = arith.constant 1 : i32
    scf.for %arg9 = %c0_i32_10 to %11 step %c1_i32  : i32 {
      %c1_i32_12 = arith.constant 1 : i32
      %12 = arith.muli %arg9, %c1_i32_12 : i32
      %c0_i32_13 = arith.constant 0 : i32
      %13 = arith.addi %c0_i32_13, %12 : i32
      %c0_14 = arith.constant 0 : index
      %c0_15 = arith.constant 0 : index
      %14 = vector.load %arg6[%c0_14, %c0_15] : memref<2x32xf32, #tpu.memory_space<vmem>>, vector<2x32xf32>
      %c0_16 = arith.constant 0 : index
      %c0_17 = arith.constant 0 : index
      %15 = vector.load %arg7[%c0_16, %c0_17] : memref<2x32xf32, #tpu.memory_space<vmem>>, vector<2x32xf32>
      %c2_i32 = arith.constant 2 : i32
      %16 = arith.muli %13, %c2_i32 : i32
      %17 = arith.index_cast %16 : i32 to index
      %c0_18 = arith.constant 0 : index
      %18 = vector.load %arg8[%17, %c0_18] : memref<16x128xf32, #tpu.memory_space<vmem>>, vector<2x128xf32>
      %cst_19 = arith.constant dense<0.000000e+00> : vector<2x128xf32>
      %19 = tpu.matmul %14, %10, %cst_19 {dimension_numbers = #tpu.dot_dimension_numbers<[1], [0], [0], [1], [0, 0, 1, 1], [], []>} : vector<2x32xf32>, vector<32x128xf32>, vector<2x128xf32> -> vector<2x128xf32>
      %20 = arith.addf %18, %19 : vector<2x128xf32>
      %21 = vector.extract_strided_slice %20 {offsets = [0, 0], sizes = [2, 96], strides = [1, 1]} : vector<2x128xf32> to vector<2x96xf32>
      %22 = arith.negf %21 : vector<2x96xf32>
      %23 = math.exp %22 : vector<2x96xf32>
      %cst_20 = arith.constant 1.000000e+00 : f32
      %24 = vector.broadcast %cst_20 : f32 to vector<2x96xf32>
      %25 = arith.addf %24, %23 : vector<2x96xf32>
      %26 = arith.divf %24, %25 : vector<2x96xf32>
      %27 = vector.extract_strided_slice %20 {offsets = [0, 96], sizes = [2, 32], strides = [1, 1]} : vector<2x128xf32> to vector<2x32xf32>
      %28 = math.tanh %27 : vector<2x32xf32>
      %29 = vector.extract_strided_slice %26 {offsets = [0, 0], sizes = [2, 32], strides = [1, 1]} : vector<2x96xf32> to vector<2x32xf32>
      %30 = vector.extract_strided_slice %26 {offsets = [0, 32], sizes = [2, 32], strides = [1, 1]} : vector<2x96xf32> to vector<2x32xf32>
      %31 = vector.extract_strided_slice %26 {offsets = [0, 64], sizes = [2, 32], strides = [1, 1]} : vector<2x96xf32> to vector<2x32xf32>
      %32 = arith.mulf %30, %15 : vector<2x32xf32>
      %33 = arith.mulf %29, %28 : vector<2x32xf32>
      %34 = arith.addf %32, %33 : vector<2x32xf32>
      %35 = math.tanh %34 : vector<2x32xf32>
      %36 = arith.mulf %31, %35 : vector<2x32xf32>
      %c0_21 = arith.constant 0 : index
      %c0_22 = arith.constant 0 : index
      %37 = vector.load %arg7[%c0_21, %c0_22] : memref<2x32xf32, #tpu.memory_space<vmem>>, vector<2x32xf32>
      tpu.vector_store %arg7[%c0_21, %c0_22], %34 {strides = array<i32>} : memref<2x32xf32, #tpu.memory_space<vmem>>, vector<2x32xf32>,
      %c0_23 = arith.constant 0 : index
      %c0_24 = arith.constant 0 : index
      %38 = vector.load %arg6[%c0_23, %c0_24] : memref<2x32xf32, #tpu.memory_space<vmem>>, vector<2x32xf32>
      tpu.vector_store %arg6[%c0_23, %c0_24], %36 {strides = array<i32>} : memref<2x32xf32, #tpu.memory_space<vmem>>, vector<2x32xf32>,
      %c2_i32_25 = arith.constant 2 : i32
      %39 = arith.muli %13, %c2_i32_25 : i32
      %40 = arith.index_cast %39 : i32 to index
      %c0_26 = arith.constant 0 : index
      %41 = vector.load %arg5[%40, %c0_26] : memref<16x32xf32, #tpu.memory_space<vmem>>, vector<2x32xf32>
      tpu.vector_store %arg5[%40, %c0_26], %36 {strides = array<i32>} : memref<16x32xf32, #tpu.memory_space<vmem>>, vector<2x32xf32>,
    }
    %c8_i32_11 = arith.constant 8 : i32
    return
  }
  func.func @transform_0(%arg0: i32) -> (i32, i32) {
    %c0_i32 = arith.constant 0 : i32
    %c0_i32_0 = arith.constant 0 : i32
    return %arg0, %c0_i32 : i32, i32
  }
  func.func @transform_1(%arg0: i32) -> (i32, i32) {
    %c0_i32 = arith.constant 0 : i32
    %c0_i32_0 = arith.constant 0 : i32
    %c0_i32_1 = arith.constant 0 : i32
    return %c0_i32, %c0_i32_0 : i32, i32
  }
  func.func @transform_2(%arg0: i32) -> (i32, i32) {
    %c0_i32 = arith.constant 0 : i32
    %c0_i32_0 = arith.constant 0 : i32
    %c0_i32_1 = arith.constant 0 : i32
    return %c0_i32, %c0_i32_0 : i32, i32
  }
  func.func @transform_3(%arg0: i32) -> (i32, i32) {
    %c0_i32 = arith.constant 0 : i32
    %c0_i32_0 = arith.constant 0 : i32
    %c0_i32_1 = arith.constant 0 : i32
    return %c0_i32, %c0_i32_0 : i32, i32
  }
  func.func @transform_4(%arg0: i32) -> (i32, i32) {
    %c0_i32 = arith.constant 0 : i32
    %c0_i32_0 = arith.constant 0 : i32
    return %arg0, %c0_i32 : i32, i32
  }
}

module attributes {stable_mosaic.version = 11 : i64} {
  func.func @_fc_head_kernel(%arg0: i32, %arg1: memref<16x32xf32, #tpu.memory_space<vmem>>, %arg2: memref<256x32xf32, #tpu.memory_space<vmem>>, %arg3: memref<1x32xf32, #tpu.memory_space<vmem>>, %arg4: memref<32x3xf32, #tpu.memory_space<vmem>>, %arg5: memref<1x3xf32, #tpu.memory_space<vmem>>, %arg6: memref<2x3xf32, #tpu.memory_space<vmem>>, %arg7: memref<2x32xf32, #tpu.memory_space<vmem>>) attributes {dimension_semantics = [#tpu.dimension_semantics<arbitrary>], iteration_bounds = array<i64: 1>, scalar_prefetch = 0 : i64, scratch_operands = 1 : i64, tpu.core_type = #tpu.core_type<tc>, window_params = [{transform_indices = @transform_0, window_bounds = array<i64: 16, 32>}, {transform_indices = @transform_1, window_bounds = array<i64: 256, 32>}, {pipeline_mode = #tpu.pipeline_mode<synchronous>, transform_indices = @transform_2, window_bounds = array<i64: 1, 32>}, {pipeline_mode = #tpu.pipeline_mode<synchronous>, transform_indices = @transform_3, window_bounds = array<i64: 32, 3>}, {pipeline_mode = #tpu.pipeline_mode<synchronous>, transform_indices = @transform_4, window_bounds = array<i64: 1, 3>}, {pipeline_mode = #tpu.pipeline_mode<synchronous>, transform_indices = @transform_5, window_bounds = array<i64: 2, 3>}]} {
    %c0_i32 = arith.constant 0 : i32
    %0 = arith.cmpi eq, %arg0, %c0_i32 : i32
    %1 = arith.extui %0 : i1 to i32
    %c0_i32_0 = arith.constant 0 : i32
    %2 = arith.cmpi ne, %1, %c0_i32_0 : i32
    scf.if %2 {
      %cst_32 = arith.constant 0.000000e+00 : f32
      %42 = vector.broadcast %cst_32 : f32 to vector<2x32xf32>
      %c0_33 = arith.constant 0 : index
      %c0_34 = arith.constant 0 : index
      %43 = vector.load %arg7[%c0_33, %c0_34] : memref<2x32xf32, #tpu.memory_space<vmem>>, vector<2x32xf32>
      tpu.vector_store %arg7[%c0_33, %c0_34], %42 {strides = array<i32>} : memref<2x32xf32, #tpu.memory_space<vmem>>, vector<2x32xf32>,
    } else {
    }
    %cst = arith.constant 0.000000e+00 : f32
    %3 = vector.broadcast %cst : f32 to vector<2x32xf32>
    %c0 = arith.constant 0 : index
    %c0_1 = arith.constant 0 : index
    %4 = vector.load %arg1[%c0, %c0_1] : memref<16x32xf32, #tpu.memory_space<vmem>>, vector<2x32xf32>
    %c0_2 = arith.constant 0 : index
    %c0_3 = arith.constant 0 : index
    %5 = vector.load %arg2[%c0_2, %c0_3] : memref<256x32xf32, #tpu.memory_space<vmem>>, vector<32x32xf32>
    %cst_4 = arith.constant dense<0.000000e+00> : vector<2x32xf32>
    %6 = tpu.matmul %4, %5, %cst_4 {dimension_numbers = #tpu.dot_dimension_numbers<[1], [0], [0], [1], [0, 0, 1, 1], [], []>} : vector<2x32xf32>, vector<32x32xf32>, vector<2x32xf32> -> vector<2x32xf32>
    %7 = arith.addf %3, %6 : vector<2x32xf32>
    %c2 = arith.constant 2 : index
    %c0_5 = arith.constant 0 : index
    %8 = vector.load %arg1[%c2, %c0_5] : memref<16x32xf32, #tpu.memory_space<vmem>>, vector<2x32xf32>
    %c32 = arith.constant 32 : index
    %c0_6 = arith.constant 0 : index
    %9 = vector.load %arg2[%c32, %c0_6] : memref<256x32xf32, #tpu.memory_space<vmem>>, vector<32x32xf32>
    %cst_7 = arith.constant dense<0.000000e+00> : vector<2x32xf32>
    %10 = tpu.matmul %8, %9, %cst_7 {dimension_numbers = #tpu.dot_dimension_numbers<[1], [0], [0], [1], [0, 0, 1, 1], [], []>} : vector<2x32xf32>, vector<32x32xf32>, vector<2x32xf32> -> vector<2x32xf32>
    %11 = arith.addf %7, %10 : vector<2x32xf32>
    %c4 = arith.constant 4 : index
    %c0_8 = arith.constant 0 : index
    %12 = vector.load %arg1[%c4, %c0_8] : memref<16x32xf32, #tpu.memory_space<vmem>>, vector<2x32xf32>
    %c64 = arith.constant 64 : index
    %c0_9 = arith.constant 0 : index
    %13 = vector.load %arg2[%c64, %c0_9] : memref<256x32xf32, #tpu.memory_space<vmem>>, vector<32x32xf32>
    %cst_10 = arith.constant dense<0.000000e+00> : vector<2x32xf32>
    %14 = tpu.matmul %12, %13, %cst_10 {dimension_numbers = #tpu.dot_dimension_numbers<[1], [0], [0], [1], [0, 0, 1, 1], [], []>} : vector<2x32xf32>, vector<32x32xf32>, vector<2x32xf32> -> vector<2x32xf32>
    %15 = arith.addf %11, %14 : vector<2x32xf32>
    %c6 = arith.constant 6 : index
    %c0_11 = arith.constant 0 : index
    %16 = vector.load %arg1[%c6, %c0_11] : memref<16x32xf32, #tpu.memory_space<vmem>>, vector<2x32xf32>
    %c96 = arith.constant 96 : index
    %c0_12 = arith.constant 0 : index
    %17 = vector.load %arg2[%c96, %c0_12] : memref<256x32xf32, #tpu.memory_space<vmem>>, vector<32x32xf32>
    %cst_13 = arith.constant dense<0.000000e+00> : vector<2x32xf32>
    %18 = tpu.matmul %16, %17, %cst_13 {dimension_numbers = #tpu.dot_dimension_numbers<[1], [0], [0], [1], [0, 0, 1, 1], [], []>} : vector<2x32xf32>, vector<32x32xf32>, vector<2x32xf32> -> vector<2x32xf32>
    %19 = arith.addf %15, %18 : vector<2x32xf32>
    %c8 = arith.constant 8 : index
    %c0_14 = arith.constant 0 : index
    %20 = vector.load %arg1[%c8, %c0_14] : memref<16x32xf32, #tpu.memory_space<vmem>>, vector<2x32xf32>
    %c128 = arith.constant 128 : index
    %c0_15 = arith.constant 0 : index
    %21 = vector.load %arg2[%c128, %c0_15] : memref<256x32xf32, #tpu.memory_space<vmem>>, vector<32x32xf32>
    %cst_16 = arith.constant dense<0.000000e+00> : vector<2x32xf32>
    %22 = tpu.matmul %20, %21, %cst_16 {dimension_numbers = #tpu.dot_dimension_numbers<[1], [0], [0], [1], [0, 0, 1, 1], [], []>} : vector<2x32xf32>, vector<32x32xf32>, vector<2x32xf32> -> vector<2x32xf32>
    %23 = arith.addf %19, %22 : vector<2x32xf32>
    %c10 = arith.constant 10 : index
    %c0_17 = arith.constant 0 : index
    %24 = vector.load %arg1[%c10, %c0_17] : memref<16x32xf32, #tpu.memory_space<vmem>>, vector<2x32xf32>
    %c160 = arith.constant 160 : index
    %c0_18 = arith.constant 0 : index
    %25 = vector.load %arg2[%c160, %c0_18] : memref<256x32xf32, #tpu.memory_space<vmem>>, vector<32x32xf32>
    %cst_19 = arith.constant dense<0.000000e+00> : vector<2x32xf32>
    %26 = tpu.matmul %24, %25, %cst_19 {dimension_numbers = #tpu.dot_dimension_numbers<[1], [0], [0], [1], [0, 0, 1, 1], [], []>} : vector<2x32xf32>, vector<32x32xf32>, vector<2x32xf32> -> vector<2x32xf32>
    %27 = arith.addf %23, %26 : vector<2x32xf32>
    %c12 = arith.constant 12 : index
    %c0_20 = arith.constant 0 : index
    %28 = vector.load %arg1[%c12, %c0_20] : memref<16x32xf32, #tpu.memory_space<vmem>>, vector<2x32xf32>
    %c192 = arith.constant 192 : index
    %c0_21 = arith.constant 0 : index
    %29 = vector.load %arg2[%c192, %c0_21] : memref<256x32xf32, #tpu.memory_space<vmem>>, vector<32x32xf32>
    %cst_22 = arith.constant dense<0.000000e+00> : vector<2x32xf32>
    %30 = tpu.matmul %28, %29, %cst_22 {dimension_numbers = #tpu.dot_dimension_numbers<[1], [0], [0], [1], [0, 0, 1, 1], [], []>} : vector<2x32xf32>, vector<32x32xf32>, vector<2x32xf32> -> vector<2x32xf32>
    %31 = arith.addf %27, %30 : vector<2x32xf32>
    %c14 = arith.constant 14 : index
    %c0_23 = arith.constant 0 : index
    %32 = vector.load %arg1[%c14, %c0_23] : memref<16x32xf32, #tpu.memory_space<vmem>>, vector<2x32xf32>
    %c224 = arith.constant 224 : index
    %c0_24 = arith.constant 0 : index
    %33 = vector.load %arg2[%c224, %c0_24] : memref<256x32xf32, #tpu.memory_space<vmem>>, vector<32x32xf32>
    %cst_25 = arith.constant dense<0.000000e+00> : vector<2x32xf32>
    %34 = tpu.matmul %32, %33, %cst_25 {dimension_numbers = #tpu.dot_dimension_numbers<[1], [0], [0], [1], [0, 0, 1, 1], [], []>} : vector<2x32xf32>, vector<32x32xf32>, vector<2x32xf32> -> vector<2x32xf32>
    %35 = arith.addf %31, %34 : vector<2x32xf32>
    %c0_26 = arith.constant 0 : index
    %c0_27 = arith.constant 0 : index
    %36 = vector.load %arg7[%c0_26, %c0_27] : memref<2x32xf32, #tpu.memory_space<vmem>>, vector<2x32xf32>
    %37 = arith.addf %36, %35 : vector<2x32xf32>
    %c0_28 = arith.constant 0 : index
    %c0_29 = arith.constant 0 : index
    %38 = vector.load %arg7[%c0_28, %c0_29] : memref<2x32xf32, #tpu.memory_space<vmem>>, vector<2x32xf32>
    tpu.vector_store %arg7[%c0_28, %c0_29], %37 {strides = array<i32>} : memref<2x32xf32, #tpu.memory_space<vmem>>, vector<2x32xf32>,
    %c0_i32_30 = arith.constant 0 : i32
    %39 = arith.cmpi eq, %arg0, %c0_i32_30 : i32
    %40 = arith.extui %39 : i1 to i32
    %c0_i32_31 = arith.constant 0 : i32
    %41 = arith.cmpi ne, %40, %c0_i32_31 : i32
    scf.if %41 {
      %c0_32 = arith.constant 0 : index
      %c0_33 = arith.constant 0 : index
      %42 = vector.load %arg7[%c0_32, %c0_33] : memref<2x32xf32, #tpu.memory_space<vmem>>, vector<2x32xf32>
      %c0_34 = arith.constant 0 : index
      %c0_35 = arith.constant 0 : index
      %43 = vector.load %arg3[%c0_34, %c0_35] : memref<1x32xf32, #tpu.memory_space<vmem>>, vector<1x32xf32>
      %44 = vector.broadcast %43 : vector<1x32xf32> to vector<2x32xf32>
      %45 = arith.addf %42, %44 : vector<2x32xf32>
      %cst_36 = arith.constant 0.000000e+00 : f32
      %46 = vector.broadcast %cst_36 : f32 to vector<2x32xf32>
      %47 = arith.maximumf %45, %46 : vector<2x32xf32>
      %c0_37 = arith.constant 0 : index
      %c0_38 = arith.constant 0 : index
      %48 = vector.load %arg4[%c0_37, %c0_38] : memref<32x3xf32, #tpu.memory_space<vmem>>, vector<32x3xf32>
      %cst_39 = arith.constant dense<0.000000e+00> : vector<2x3xf32>
      %49 = tpu.matmul %47, %48, %cst_39 {dimension_numbers = #tpu.dot_dimension_numbers<[1], [0], [0], [1], [0, 0, 1, 1], [], []>} : vector<2x32xf32>, vector<32x3xf32>, vector<2x3xf32> -> vector<2x3xf32>
      %c0_40 = arith.constant 0 : index
      %c0_41 = arith.constant 0 : index
      %50 = vector.load %arg5[%c0_40, %c0_41] : memref<1x3xf32, #tpu.memory_space<vmem>>, vector<1x3xf32>
      %51 = vector.broadcast %50 : vector<1x3xf32> to vector<2x3xf32>
      %52 = arith.addf %49, %51 : vector<2x3xf32>
      %c0_42 = arith.constant 0 : index
      %c0_43 = arith.constant 0 : index
      %53 = vector.load %arg6[%c0_42, %c0_43] : memref<2x3xf32, #tpu.memory_space<vmem>>, vector<2x3xf32>
      tpu.vector_store %arg6[%c0_42, %c0_43], %52 {strides = array<i32>} : memref<2x3xf32, #tpu.memory_space<vmem>>, vector<2x3xf32>,
    } else {
    }
    return
  }
  func.func @transform_0(%arg0: i32) -> (i32, i32) {
    %c0_i32 = arith.constant 0 : i32
    %c0_i32_0 = arith.constant 0 : i32
    return %arg0, %c0_i32 : i32, i32
  }
  func.func @transform_1(%arg0: i32) -> (i32, i32) {
    %c0_i32 = arith.constant 0 : i32
    %c0_i32_0 = arith.constant 0 : i32
    return %arg0, %c0_i32 : i32, i32
  }
  func.func @transform_2(%arg0: i32) -> (i32, i32) {
    %c0_i32 = arith.constant 0 : i32
    %c0_i32_0 = arith.constant 0 : i32
    %c0_i32_1 = arith.constant 0 : i32
    return %c0_i32, %c0_i32_0 : i32, i32
  }
  func.func @transform_3(%arg0: i32) -> (i32, i32) {
    %c0_i32 = arith.constant 0 : i32
    %c0_i32_0 = arith.constant 0 : i32
    %c0_i32_1 = arith.constant 0 : i32
    return %c0_i32, %c0_i32_0 : i32, i32
  }
  func.func @transform_4(%arg0: i32) -> (i32, i32) {
    %c0_i32 = arith.constant 0 : i32
    %c0_i32_0 = arith.constant 0 : i32
    %c0_i32_1 = arith.constant 0 : i32
    return %c0_i32, %c0_i32_0 : i32, i32
  }
  func.func @transform_5(%arg0: i32) -> (i32, i32) {
    %c0_i32 = arith.constant 0 : i32
    %c0_i32_0 = arith.constant 0 : i32
    %c0_i32_1 = arith.constant 0 : i32
    return %c0_i32, %c0_i32_0 : i32, i32
  }
}

</mosaic_0001>

<bundles_post_ra>
// kernel: tile.0
= control target key start
LH: loop header
LB: loop body
LE: loop exit
PB: predicated region body
PF: predicated region fallthrough
CT: control target
= control target key end

     0   :  { %s67_s8 = smov 125   ;;  %vm8_vm0 = vcmask 7168   ;;  %s68_s11 = smov 126   ;;  %s118_s0 = inlined_call_operand.vmem [shape: s32[2,8], index: 0, kind: input, shape index: {}]   ;;  %s119_s1 = inlined_call_operand.vmem [shape: s32[16,1], index: 1, kind: output, shape index: {}]  }
   0x1   :  { %v5_v0 = vld [vmem:[%s118_s0] sm:$0x3]  ;;  %s66_s0 = smov 127   ;;  %s69_s12 = smov 124  }
   0x2   :  { %6 = vst [vmem:[#allocation0] sm:$0x3] %v5_v0  ;;  %s70_s13 = smov 123   ;;  %s71_s14 = smov 122  }
   0x3   :  { %s72_s15 = smov 121  }
   0x9   :  { %v10_v1 = vld [vmem:[#allocation0] sm:$0x3]  }
   0xa   :  { %v22_v2 = vld [vmem:[#allocation0] sm:$0x3]   ;;  %11 = vrot.lane.b32.xlu0 %v10_v1, %s66_s0 }
   0xb   :  { %23 = vrot.lane.b32.xlu1 %v22_v2, %s67_s8  ;;  %v16_v3 = vld [vmem:[#allocation0] sm:$0x3]  }
   0xc   :  { %v28_v4 = vld [vmem:[#allocation0] sm:$0x3]  }
   0xd   :  { %v7_v5 = vld [vmem:[#allocation0] sm:$0x3]  }
   0xe   :  { %9 = vst.msk [vmem:[%s119_s1] ss:$8 sm:$0x3] %vm8_vm0, %v7_v5   ;;  %17 = vrot.lane.b32.xlu0 %v16_v3, %s68_s11  ;;  %v34_v6 = vld [vmem:[#allocation0] sm:$0x3]  }
   0xf   :  { %29 = vrot.lane.b32.xlu1 %v28_v4, %s69_s12  ;;  %v40_v7 = vld [vmem:[#allocation0] sm:$0x3]  }
  0x10   :  { %v46_v8 = vld [vmem:[#allocation0] sm:$0x3]  }
  0x12   :  { %35 = vrot.lane.b32.xlu0 %v34_v6, %s70_s13 }
  0x13   :  { %41 = vrot.lane.b32.xlu1 %v40_v7, %s71_s14 }
  0x16   :  { %47 = vrot.lane.b32.xlu0 %v46_v8, %s72_s15 }
  0x7c   :  { %v12_v9 = vpop.permute.xlu0 %11  }
  0x7d   :  { %v24_v10 = vpop.permute.xlu1 %23   ;;  %52 = vst.msk [vmem:[%s119_s1 + $0x1] ss:$8 sm:$0x3] %vm8_vm0, %v12_v9  }
  0x7e   :  { %54 = vst.msk [vmem:[%s119_s1 + $0x3] ss:$8 sm:$0x3] %vm8_vm0, %v24_v10  }
  0x80   :  { %v18_v11 = vpop.permute.xlu0 %17  }
  0x81   :  { %v30_v12 = vpop.permute.xlu1 %29   ;;  %53 = vst.msk [vmem:[%s119_s1 + $0x2] ss:$8 sm:$0x3] %vm8_vm0, %v18_v11  }
  0x82   :  { %55 = vst.msk [vmem:[%s119_s1 + $0x4] ss:$8 sm:$0x3] %vm8_vm0, %v30_v12  }
  0x84   :  { %v36_v13 = vpop.permute.xlu0 %35  }
  0x85   :  { %v42_v14 = vpop.permute.xlu1 %41   ;;  %56 = vst.msk [vmem:[%s119_s1 + $0x5] ss:$8 sm:$0x3] %vm8_vm0, %v36_v13  }
  0x86   :  { %57 = vst.msk [vmem:[%s119_s1 + $0x6] ss:$8 sm:$0x3] %vm8_vm0, %v42_v14  }
  0x88   :  { %v48_v15 = vpop.permute.xlu0 %47  }
  0x89   :  { %58 = vst.msk [vmem:[%s119_s1 + $0x7] ss:$8 sm:$0x3] %vm8_vm0, %v48_v15  }

// kernel: cnn_lstm_forward.4
= control target key start
LH: loop header
LB: loop body
LE: loop exit
PB: predicated region body
PF: predicated region fallthrough
CT: control target
= control target key end

     0   :  { %vm21_vm0 = vcmask 254976   ;;  %vm34_vm1 = vcmask 64512   ;;  %v322_v0 = vmov 0.0   ;;  %s387_s29 = smov 0   ;;  %s410_s1 = inlined_call_operand.vmem [shape: f32[8,128], index: 1, kind: input, shape index: {}]   ;;  %s411_s4 = inlined_call_operand.vmem [shape: f32[16,32], index: 4, kind: output, shape index: {}]   ;;  %s412_s0 = inlined_call_operand.vmem [shape: f32[16,8], index: 0, kind: input, shape index: {}]   ;;  %s413_s2 = inlined_call_operand.vmem [shape: f32[32,128], index: 2, kind: input, shape index: {}]   ;;  %s414_s3 = inlined_call_operand.vmem [shape: f32[1,128], index: 3, kind: input, shape index: {}]  }
   0x1   :  { %22 = vst.msk [vmem:[#allocation2] sm:$0x3] %vm21_vm0, %v322_v0  ;;  %23 = vst.msk [vmem:[#allocation3] sm:$0x3] %vm21_vm0, %v322_v0  ;;  %v26_v1 = vld [vmem:[%s410_s1] sm:$0xff]  ;;  %v25_v3 = vld [vmem:[%s412_s0 + $0x8] sm:$0xff] }
   0x2   :  { %v24_v2 = vld [vmem:[%s412_s0] sm:$0xff]  ;;  %276 = vmatprep.subr.mxu0 %v26_v1  ;;  %v372_v5 = vld [vmem:[%s413_s2 + $0x8] sm:$0xff]  ;;  %v377_v6 = vld [vmem:[%s413_s2 + $0x10] sm:$0xff] }
   0x3   :  { %278 = vmatprep.mubr.msk.f32.mxu0 %vm34_vm1, %v24_v2  ;;  %277 = vmatpush3.msra.mxu0 %v26_v1  ;;  %v367_v4 = vld [vmem:[%s413_s2] sm:$0xff]  ;;  %v382_v7 = vld [vmem:[%s413_s2 + $0x18] sm:$0xff] }
   0x4   :  { %279 = vmatmul.mubr.msk.f32.vlgmr.msra.gmra.mxu0 %vm34_vm1, %v25_v3  ;;  %v262_v8 = vld [vmem:[%s414_s3] ss:$0 sm:$0xff] }
  0xc4   :  { %v280_v9 = vpop.f32.mrf.mxu0 }
  0xc5   :  { %v113_v10 = vadd.f32 %v280_v9, %v262_v8 }
  0xc6   :  { %v107_v11 = vpop.f32.mrf.mxu0 }
  0xc7   :  { %117 = vst [vmem:[#allocation4 + $0x8] sm:$0xff] %v113_v10  ;;  %v108_v12 = vadd.f32 %v262_v8, %v107_v11 }
  0xc9   :  { %116 = vst [vmem:[#allocation4] sm:$0xff] %v108_v12 }
  0xca LB: > { %v323_v13 = vmov 0.0   ;;  %vm324_vm2 = vmmov 0   ;;  %v128_v14 = vld [vmem:[#allocation2] sm:$0x3]  ;;  %vm133_vm3 = vcmask 261120   ;;  %s265_s2 = sshll.u32 %s320_s29, 1  ;;  %s320_s29 = sphi %s387_s29, %s127_s29  }
  0xcb   : > { %281 = vmatprep.subr.mxu0 %v323_v13  ;;  %289 = vmatprep.mubr.msk.f32.mxu0 %vm324_vm2, %v323_v13  ;;  %s131_s3 = scalar_lea.vmem [#allocation4], %s265_s2  ;;  %s325_s30 = smov 32   ;;  %v129_v20 = vld [vmem:[#allocation3] sm:$0x3] }
  0xcc   : > { %282 = vmatpush3.msra.mxu0 %v382_v7  ;;  %s326_s5 = smov 96   ;;  %s327_s6 = smov 64  }
  0xcd   : > { %283 = vmatprep.subr.mxu0 %v323_v13  ;;  %s247_s9 = scalar_lea.vmem %s411_s4, %s265_s2  ;;  %s127_s29 = sadd.s32 1, %s320_s29  }
  0xce   : > { %284 = vmatpush3.msra.mxu0 %v377_v6  ;;  %p124_p0 = scmp.ge.s32.totalorder %s127_s29, 8  }
  0xcf   : > { %285 = vmatprep.subr.mxu0 %v323_v13 }
  0xd0   : > { %286 = vmatpush3.msra.mxu0 %v372_v5  ;;  %v132_v15 = vld [vmem:[%s131_s3] sm:$0x3] }
  0xd1   : > { %287 = vmatprep.subr.mxu0 %v323_v13 }
  0xd2   : > { %288 = vmatpush3.msra.mxu0 %v367_v4 }
  0xd3   : > { %290 = vmatmul.mubr.msk.f32.vlgmr.msra.gmra.mxu0 %vm133_vm3, %v128_v14 }
 0x193   : > { %v203_v16 = vpop.f32.mrf.mxu0 }
 0x194   : > { %v207_v17 = vadd.f32 %v203_v16, %v132_v15 }
 0x195   : > { %v291_v18 = vpop.f32.mrf.mxu0 }
 0x196   : > { %306 = vtanh.f32 %v207_v17  ;;  %v267_v21 = vmul.f32 -1.442695, %v207_v17 }
 0x198   : > { %308 = vpow2.f32 %v267_v21 }
 0x1a3   : > { %v307_v19 = vpop.eup %306 }
 0x1a4   : > { %221 = vrot.lane.b32.xlu0 %v307_v19, %s325_s30 }
 0x1a5   : > { %v309_v22 = vpop.eup %308 }
 0x1a6   : > { %v211_v23 = vadd.f32 1.0, %v309_v22 }
 0x1a8   : > { %216 = vrot.lane.b32.xlu0 %v129_v20, %s325_s30  ;;  %310 = vrcp.f32 %v211_v23 }
 0x1b5   : > { %v311_v24 = vpop.eup %310 }
 0x216   : > { %v222_v25 = vpop.permute.xlu0 %221 }
 0x217   : > { %v224_v26 = vmul.f32 %v311_v24, %v222_v25 }
 0x219   : > { %226 = vrot.lane.b32.xlu1 %v224_v26, %s325_s30 }
 0x21a   : > { %v217_v27 = vpop.permute.xlu0 %216 }
 0x21b   : > { %v219_v28 = vmul.f32 %v311_v24, %v217_v27 }
 0x28b   : > { %v227_v29 = vpop.permute.xlu1 %226 }
 0x28c   : > { %v229_v30 = vadd.f32 %v227_v29, %v219_v28 }
 0x28e   : > { %312 = vtanh.f32 %v229_v30  ;;  %237 = vrot.lane.b32.xlu0 %v229_v30, %s326_s5 }
 0x29b   : > { %v313_v31 = vpop.eup %312 }
 0x29c   : > { %232 = vrot.lane.b32.xlu1 %v313_v31, %s325_s30 }
 0x300   : > { %v238_v32 = vpop.permute.xlu0 %237 }
 0x301   : > { %241 = vst.msk [vmem:[#allocation3] sm:$0x3] %vm21_vm0, %v238_v32 }
 0x30e   : > { %v233_v33 = vpop.permute.xlu1 %232 }
 0x30f   : > { %v235_v34 = vmul.f32 %v311_v24, %v233_v33 }
 0x311   : > { %243 = vrot.lane.b32.xlu1 %v235_v34, %s327_s6 }
 0x380   :  { %126 = sbr.rel (!%p124_p0) target bundleno = 202 (0xca), region = 49 }
 0x383   : > { %v244_v35 = vpop.permute.xlu1 %243 }
 0x384   : > { %246 = vst.msk [vmem:[#allocation2] sm:$0x3] %vm21_vm0, %v244_v35  ;;  %248 = vst.msk [vmem:[%s247_s9] sm:$0x3] %vm21_vm0, %v244_v35 }

// kernel: cnn_lstm_forward.3
= control target key start
LH: loop header
LB: loop body
LE: loop exit
PB: predicated region body
PF: predicated region fallthrough
CT: control target
= control target key end

     0   :  { %vm70_vm0 = vcmask 31744   ;;  %v454_v0 = vmov 0   ;;  %vm75_vm1 = vcmask 1043456   ;;  %vm47_vm6 = vcmask 1046528   ;;  %s538_s1 = inlined_call_operand.vmem [shape: s32[16,1], index: 1, kind: input, shape index: {}]   ;;  %s539_s0 = inlined_call_operand.vmem [shape: f32[16,4], index: 0, kind: input, shape index: {}]   ;;  %s540_s2 = inlined_call_operand.vmem [shape: f32[3,4,8], index: 2, kind: input, shape index: {}]   ;;  %s541_s4 = inlined_call_operand.vmem [shape: f32[8,2,8], index: 4, kind: output, shape index: {}]   ;;  %s542_s3 = inlined_call_operand.vmem [shape: f32[1,8], index: 3, kind: input, shape index: {}]  }
   0x1   :  { %445 = vset.pattern.permute.xlu1 %v454_v0  ;;  %444 = vset.pattern.permute.xlu0 %v454_v0  ;;  %v19_v1 = vld [vmem:[%s538_s1] sm:$0xff]  ;;  %v20_v2 = vld [vmem:[%s538_s1 + $0x8] sm:$0xff]  ;;  %vm29_vm7 = vcmask 1040384   ;;  %vm361_vm12 = vcmask 64512  }
   0x2   :  { %v17_v3 = vld [vmem:[%s539_s0] sm:$0xff]  ;;  %vm23_vm2 = vcmp.eq.s32.totalorder %v19_v1, 7  ;;  %vm21_vm3 = vcmp.eq.s32.totalorder %v19_v1, 0  ;;  %vm24_vm4 = vcmp.eq.s32.totalorder %v20_v2, 7  ;;  %vm22_vm5 = vcmp.eq.s32.totalorder %v20_v2, 0  ;;  %v18_v4 = vld [vmem:[%s539_s0 + $0x8] sm:$0xff] }
   0x3   :  { %422 = vmatprep.mubr.msk.f32.mxu0 %vm70_vm0, %v17_v3  ;;  %v55_v5 = vsel %vm23_vm2, 1, %v454_v0  ;;  %v35_v6 = vsel %vm21_vm3, 1, %v454_v0  ;;  %v397_v7 = vld [vmem:[%s540_s2 + $0x4] sm:$0xf]  ;;  %v48_v8 = vrot.slane %v17_v3, 1  ;;  %v49_v9 = vrot.slane %v18_v4, 1 }
   0x4   :  { %58 = vperm.xlu1 %445, %v55_v5   ;;  %38 = vperm.xlu0 %444, %v35_v6   ;;  %v26_v10 = vrot.slane %v18_v4, 7  ;;  %v30_v11 = vrot.slane %v17_v3, 7  ;;  %v404_v12 = vld [vmem:[%s540_s2 + $0x8] sm:$0xf]  ;;  %v56_v13 = vsel %vm24_vm4, 1, %v454_v0  ;;  %v36_v14 = vsel %vm22_vm5, 1, %v454_v0 }
   0x5   :  { %420 = vmatprep.subr.msk.mxu0 %vm75_vm1, %v397_v7  ;;  %v50_v15 = vsel %vm47_vm6, %v48_v8, %v49_v9  ;;  %v54_v17 = vsel %vm47_vm6, %v49_v9, %v48_v8  ;;  %v67_v19 = vld [vmem:[%s540_s2] sm:$0xf] }
   0x6   :  { %421 = vmatpush3.msk.msra.mxu0 %vm75_vm1, %v397_v7  ;;  %v34_v16 = vsel %vm29_vm7, %v26_v10, %v30_v11  ;;  %v31_v18 = vsel %vm29_vm7, %v30_v11, %v26_v10  ;;  %425 = vmatprep.subr.msk.mxu1 %vm75_vm1, %v67_v19  ;;  %v408_v33 = vld [vmem:[%s542_s3] ss:$0 sm:$0xff]  ;;  %s450_s3 = smov 0  }
   0x7   :  { %423 = vmatmul.mubr.msk.f32.vlgmr.msra.gmra.mxu0 %vm70_vm0, %v18_v4  ;;  %430 = vmatprep.subr.msk.mxu0 %vm75_vm1, %v404_v12 }
   0x8   :  { %61 = vperm.xlu1 %445, %v56_v13   ;;  %41 = vperm.xlu0 %444, %v36_v14  }
   0x9   :  { %431 = vmatpush3.msk.msra.mxu0 %vm75_vm1, %v404_v12  ;;  %426 = vmatpush3.msk.msra.mxu1 %vm75_vm1, %v67_v19 }
  0x7f   :  { %v59_v20 = vpop.permute.xlu1 %58  ;;  %v39_v21 = vpop.permute.xlu0 %38 }
  0x80   :  { %vm63_vm8 = vcmp.eq.s32.totalorder %v59_v20, 1  ;;  %vm43_vm9 = vcmp.eq.s32.totalorder %v39_v21, 1 }
  0x81   :  { %v65_v22 = vsel %vm63_vm8, 0.0, %v50_v15  ;;  %v45_v23 = vsel %vm43_vm9, 0.0, %v34_v16 }
  0x82   :  { %427 = vmatprep.mubr.msk.f32.mxu1 %vm70_vm0, %v45_v23  ;;  %432 = vmatprep.mubr.msk.f32.mxu0 %vm70_vm0, %v65_v22 }
  0x83   :  { %v62_v24 = vpop.permute.xlu1 %61  ;;  %v42_v25 = vpop.permute.xlu0 %41 }
  0x84   :  { %vm64_vm10 = vcmp.eq.s32.totalorder %v62_v24, 1  ;;  %vm44_vm11 = vcmp.eq.s32.totalorder %v42_v25, 1 }
  0x85   :  { %v66_v26 = vsel %vm64_vm10, 0.0, %v54_v17  ;;  %v46_v27 = vsel %vm44_vm11, 0.0, %v31_v18 }
  0x86   :  { %428 = vmatmul.mubr.msk.f32.vlgmr.msra.gmra.mxu1 %vm70_vm0, %v46_v27  ;;  %433 = vmatmul.mubr.msk.f32.vlgmr.msra.gmra.mxu0 %vm70_vm0, %v66_v26 }
  0xc7   :  { %v424_v28 = vpop.f32.mrf.mxu0 }
  0xc9   :  { %v145_v29 = vpop.f32.mrf.mxu0 }
 0x146   :  { %v429_v30 = vpop.f32.mrf.mxu1  ;;  %v434_v31 = vpop.f32.mrf.mxu0 }
 0x147   :  { %v235_v32 = vadd.f32 %v429_v30, %v424_v28 }
 0x148   :  { %v229_v34 = vpop.f32.mrf.mxu1  ;;  %v315_v37 = vpop.f32.mrf.mxu0 }
 0x149   :  { %v325_v35 = vadd.f32 %v434_v31, %v235_v32  ;;  %v230_v36 = vadd.f32 %v229_v34, %v145_v29 }
 0x14b   :  { %v334_v38 = vadd.f32 %v408_v33, %v325_v35  ;;  %v324_v39 = vadd.f32 %v315_v37, %v230_v36 }
 0x14d   :  { %v336_v40 = vmax.f32 %v334_v38, 0.0  ;;  %v333_v41 = vadd.f32 %v408_v33, %v324_v39 }
 0x14f   :  { %v335_v42 = vmax.f32 %v333_v41, 0.0  ;;  %v338_v43 = vrot.slane %v336_v40, 7  ;;  %v349_v44 = vrot.slane %v336_v40, 1 }
 0x151   :  { %v341_v45 = vrot.slane %v335_v42, 7  ;;  %v348_v46 = vrot.slane %v335_v42, 1 }
 0x153   :  { %v342_v47 = vsel %vm29_vm7, %v341_v45, %v338_v43  ;;  %v345_v48 = vsel %vm29_vm7, %v338_v43, %v341_v45  ;;  %v350_v49 = vsel %vm47_vm6, %v348_v46, %v349_v44  ;;  %v354_v50 = vsel %vm47_vm6, %v349_v44, %v348_v46 }
 0x154   :  { %v346_v51 = vsel %vm43_vm9, 0.0, %v345_v48  ;;  %v347_v52 = vsel %vm44_vm11, 0.0, %v342_v47  ;;  %v355_v55 = vsel %vm63_vm8, 0.0, %v350_v49  ;;  %v356_v56 = vsel %vm64_vm10, 0.0, %v354_v50 }
 0x155   :  { %v357_v53 = vmax.f32 %v346_v51, %v335_v42  ;;  %v358_v54 = vmax.f32 %v347_v52, %v336_v40 }
 0x157   :  { %v359_v57 = vmax.f32 %v357_v53, %v355_v55  ;;  %v360_v58 = vmax.f32 %v358_v54, %v356_v56 }
 0x159   :  { %362 = vst.msk [vmem:[#allocation2] sm:$0xff] %vm361_vm12, %v359_v57  ;;  %363 = vst.msk [vmem:[#allocation2 + $0x8] sm:$0xff] %vm361_vm12, %v360_v58 }
 0x15a LB: > { %s410_s28 = sshll.u32 %s452_s3, 1  ;;  %s370_s29 = scalar_lea.vmem [#allocation2], %s452_s3  ;;  %vm381_vm13 = vcmask 58368   ;;  %s452_s3 = sphi %s450_s3, %s369_s3  }
 0x15b   : > { %s380_s6 = scalar_lea.vmem %s541_s4, %s410_s28  ;;  %s369_s3 = sadd.s32 1, %s452_s3  }
 0x15c   : > { %p366_p0 = scmp.ge.s32.totalorder %s369_s3, 8  }
 0x160   : > { %v371_v59 = vld [vmem:[%s370_s29] sm:$0x1]  ;;  %v409_v60 = vld [vmem:[%s370_s29 + $0x8] sm:$0x1]  ;;  %368 = sbr.rel (!%p366_p0) target bundleno = 346 (0x15a), region = 48 }
 0x161   : > { %v376_v61 = vrot.slane %v409_v60, 7 }
 0x163   : > { %v378_v62 = vsel %vm29_vm7, %v371_v59, %v376_v61 }
 0x164   : > { %382 = vst.msk [vmem:[%s380_s6] sm:$0x3] %vm381_vm13, %v378_v62 }

// kernel: cnn_lstm_forward.5
= control target key start
LH: loop header
LB: loop body
LE: loop exit
PB: predicated region body
PF: predicated region fallthrough
CT: control target
= control target key end

     0   :  { %v955_v2 = vmov 0.0   ;;  %vm37_vm0 = vcmask 261120   ;;  %vm956_vm1 = vmmov 0   ;;  %s1195_s0 = inlined_call_operand.vmem [shape: f32[16,32], index: 0, kind: input, shape index: {}]   ;;  %s1196_s1 = inlined_call_operand.vmem [shape: f32[256,32], index: 1, kind: input, shape index: {}]   ;;  %s1197_s2 = inlined_call_operand.vmem [shape: f32[1,32], index: 2, kind: input, shape index: {}]   ;;  %s1198_s3 = inlined_call_operand.vmem [shape: f32[32,3], index: 3, kind: input, shape index: {}]   ;;  %s1199_s4 = inlined_call_operand.vmem [shape: f32[1,3], index: 4, kind: input, shape index: {}]   ;;  %s1200_s5 = inlined_call_operand.hbm [shape: f32[2,3], index: 5, kind: output, shape index: {}]  }
   0x1   :  { %v36_v0 = vld [vmem:[%s1196_s1 + $0x38] sm:$0xff]  ;;  %831 = vmatprep.subr.mxu0 %v955_v2  ;;  %842 = vmatprep.subr.mxu1 %v955_v2  ;;  %v35_v3 = vld [vmem:[%s1196_s1 + $0x30] sm:$0xff]  ;;  %v34_v5 = vld [vmem:[%s1196_s1 + $0x28] sm:$0xff] }
   0x2   :  { %v31_v1 = vld [vmem:[%s1196_s1 + $0x18] sm:$0xff]  ;;  %v30_v4 = vld [vmem:[%s1196_s1 + $0x10] sm:$0xff]  ;;  %832 = vmatpush3.msra.mxu0 %v36_v0  ;;  %v29_v6 = vld [vmem:[%s1196_s1 + $0x8] sm:$0xff]  ;;  %839 = vmatprep.mubr.msk.f32.mxu0 %vm956_vm1, %v955_v2 }
   0x3   :  { %843 = vmatpush3.msra.mxu1 %v31_v1  ;;  %833 = vmatprep.subr.mxu0 %v955_v2  ;;  %v33_v7 = vld [vmem:[%s1196_s1 + $0x20] sm:$0xff]  ;;  %v188_v11 = vld [vmem:[%s1196_s1 + $0x58] sm:$0xff]  ;;  %v187_v13 = vld [vmem:[%s1196_s1 + $0x50] sm:$0xff] }
   0x4   :  { %844 = vmatprep.subr.mxu1 %v955_v2  ;;  %834 = vmatpush3.msra.mxu0 %v35_v3  ;;  %v28_v8 = vld [vmem:[%s1196_s1] sm:$0xff]  ;;  %v267_v12 = vld [vmem:[%s1196_s1 + $0x78] sm:$0xff]  ;;  %v266_v14 = vld [vmem:[%s1196_s1 + $0x70] sm:$0xff] }
   0x5   :  { %845 = vmatpush3.msra.mxu1 %v30_v4  ;;  %835 = vmatprep.subr.mxu0 %v955_v2  ;;  %v32_v9 = vld [vmem:[%s1195_s0 + $0x2] sm:$0x3]  ;;  %v27_v10 = vld [vmem:[%s1195_s0] sm:$0x3]  ;;  %v186_v15 = vld [vmem:[%s1196_s1 + $0x48] sm:$0xff] }
   0x6   :  { %846 = vmatprep.subr.mxu1 %v955_v2  ;;  %836 = vmatpush3.msra.mxu0 %v34_v5  ;;  %v265_v16 = vld [vmem:[%s1196_s1 + $0x68] sm:$0xff] }
   0x7   :  { %847 = vmatpush3.msra.mxu1 %v29_v6  ;;  %837 = vmatprep.subr.mxu0 %v955_v2 }
   0x8   :  { %848 = vmatprep.subr.mxu1 %v955_v2  ;;  %838 = vmatpush3.msra.mxu0 %v33_v7 }
   0x9   :  { %849 = vmatpush3.msra.mxu1 %v28_v8  ;;  %840 = vmatmul.mubr.msk.f32.vlgmr.msra.gmra.mxu0 %vm37_vm0, %v32_v9 }
   0xa   :  { %850 = vmatprep.mubr.msk.f32.mxu1 %vm956_vm1, %v955_v2  ;;  %853 = vmatprep.subr.mxu0 %v955_v2 }
   0xb   :  { %864 = vmatprep.subr.mxu1 %v955_v2  ;;  %851 = vmatmul.mubr.msk.f32.vlgmr.msra.gmra.mxu1 %vm37_vm0, %v27_v10 }
   0xc   :  { %854 = vmatpush3.msra.mxu0 %v188_v11  ;;  %865 = vmatpush3.msra.mxu1 %v267_v12 }
   0xd   :  { %855 = vmatprep.subr.mxu0 %v955_v2  ;;  %866 = vmatprep.subr.mxu1 %v955_v2 }
   0xe   :  { %10 = vsyncpa [#allocation4], 0  ;;  %856 = vmatpush3.msra.mxu0 %v187_v13  ;;  %867 = vmatpush3.msra.mxu1 %v266_v14  ;;  %v185_v17 = vld [vmem:[%s1196_s1 + $0x40] sm:$0xff]  ;;  %v346_v21 = vld [vmem:[%s1196_s1 + $0x98] sm:$0xff]  ;;  %vm25_vm2 = vcmask 254976   ;;  %s957_s7 = smov [#allocation3]  }
   0xf   :  { %857 = vmatprep.subr.mxu0 %v955_v2  ;;  %868 = vmatprep.subr.mxu1 %v955_v2  ;;  %v264_v18 = vld [vmem:[%s1196_s1 + $0x60] sm:$0xff]  ;;  %v425_v22 = vld [vmem:[%s1196_s1 + $0xb8] sm:$0xff]  ;;  %v345_v23 = vld [vmem:[%s1196_s1 + $0x90] sm:$0xff]  ;;  %26 = vst.msk [vmem:[#allocation2] sm:$0x3] %vm25_vm2, %v955_v2  ;;  %s767_s8 = sshll.u32 %s957_s7, 4  ;;  %s768_s8 = int_to_ptr.vmem [resolvable:$true] %s767_s8 }
  0x10   :  { %858 = vmatpush3.msra.mxu0 %v186_v15  ;;  %869 = vmatpush3.msra.mxu1 %v265_v16  ;;  %v184_v19 = vld [vmem:[%s1195_s0 + $0x4] sm:$0x3]  ;;  %v263_v20 = vld [vmem:[%s1195_s0 + $0x6] sm:$0x3]  ;;  %v424_v24 = vld [vmem:[%s1196_s1 + $0xb0] sm:$0xff]  ;;  %vm759_vm3 = vcmask 17408   ;;  %p938_p1 = scmp.lt.s32.totalorder %s768_s8, %s768_s8 }
  0x11   :  { %859 = vmatprep.subr.mxu0 %v955_v2  ;;  %870 = vmatprep.subr.mxu1 %v955_v2  ;;  %v344_v25 = vld [vmem:[%s1196_s1 + $0x88] sm:$0xff]  ;;  %v343_v27 = vld [vmem:[%s1196_s1 + $0x80] sm:$0xff]  ;;  %v504_v31 = vld [vmem:[%s1196_s1 + $0xd8] sm:$0xff]  ;;  %s933_s9 = scalar_lea.vmem %s768_s8, 32 }
  0x12   :  { %860 = vmatpush3.msra.mxu0 %v185_v17  ;;  %861 = vmatprep.mubr.msk.f32.mxu0 %vm956_vm1, %v955_v2  ;;  %v423_v26 = vld [vmem:[%s1196_s1 + $0xa8] sm:$0xff]  ;;  %v422_v28 = vld [vmem:[%s1196_s1 + $0xa0] sm:$0xff]  ;;  %v583_v32 = vld [vmem:[%s1196_s1 + $0xf8] sm:$0xff]  ;;  %p934_p0 = scmp.ne.s32.totalorder %s768_s8, %s933_s9  ;;  %p939_p2 = scmp.lt.s32.totalorder %s933_s9, %s933_s9 }
  0x13   :  { %871 = vmatpush3.msra.mxu1 %v264_v18  ;;  %862 = vmatmul.mubr.msk.f32.vlgmr.msra.gmra.mxu0 %vm37_vm0, %v184_v19  ;;  %v342_v29 = vld [vmem:[%s1195_s0 + $0x8] sm:$0x3]  ;;  %v421_v30 = vld [vmem:[%s1195_s0 + $0xa] sm:$0x3]  ;;  %v503_v33 = vld [vmem:[%s1196_s1 + $0xd0] sm:$0xff] }
  0x14   :  { %872 = vmatprep.mubr.msk.f32.mxu1 %vm956_vm1, %v955_v2  ;;  %875 = vmatprep.subr.mxu0 %v955_v2  ;;  %v582_v34 = vld [vmem:[%s1196_s1 + $0xf0] sm:$0xff]  ;;  %v502_v35 = vld [vmem:[%s1196_s1 + $0xc8] sm:$0xff]  ;;  %v501_v37 = vld [vmem:[%s1196_s1 + $0xc0] sm:$0xff]  ;;  %p940_p3 = por %p939_p2, %p938_p1 }
  0x15   :  { %886 = vmatprep.subr.mxu1 %v955_v2  ;;  %873 = vmatmul.mubr.msk.f32.vlgmr.msra.gmra.mxu1 %vm37_vm0, %v263_v20  ;;  %v581_v36 = vld [vmem:[%s1196_s1 + $0xe8] sm:$0xff]  ;;  %v580_v38 = vld [vmem:[%s1196_s1 + $0xe0] sm:$0xff]  ;;  %v678_v41 = vld [vmem:[%s1198_s3 + $0x18] sm:$0xff] }
  0x16   :  { %876 = vmatpush3.msra.mxu0 %v346_v21  ;;  %887 = vmatpush3.msra.mxu1 %v425_v22  ;;  %v500_v39 = vld [vmem:[%s1195_s0 + $0xc] sm:$0x3]  ;;  %v579_v40 = vld [vmem:[%s1195_s0 + $0xe] sm:$0x3]  ;;  %v677_v42 = vld [vmem:[%s1198_s3 + $0x10] sm:$0xff]  ;;  %p941_p4 = pnand %p940_p3, %p934_p0 }
  0x17   :  { %877 = vmatprep.subr.mxu0 %v955_v2  ;;  %888 = vmatprep.subr.mxu1 %v955_v2  ;;  %v676_v43 = vld [vmem:[%s1198_s3 + $0x8] sm:$0xff]  ;;  %v675_v44 = vld [vmem:[%s1198_s3] sm:$0xff] }
  0x18   :  { %878 = vmatpush3.msra.mxu0 %v345_v23  ;;  %889 = vmatpush3.msra.mxu1 %v424_v24  ;;  %v658_v1 = vld [vmem:[#allocation2] sm:$0x3] }
  0x19   :  { %879 = vmatprep.subr.mxu0 %v955_v2  ;;  %890 = vmatprep.subr.mxu1 %v955_v2  ;;  %v783_v6 = vld [vmem:[%s1197_s2] ss:$0 sm:$0xff] }
  0x1a   :  { %880 = vmatpush3.msra.mxu0 %v344_v25  ;;  %891 = vmatpush3.msra.mxu1 %v423_v26  ;;  %v784_v10 = vld [vmem:[%s1199_s4] ss:$0 sm:$0xff] }
  0x1b   :  { %881 = vmatprep.subr.mxu0 %v955_v2  ;;  %892 = vmatprep.subr.mxu1 %v955_v2 }
  0x1c   :  { %882 = vmatpush3.msra.mxu0 %v343_v27  ;;  %883 = vmatprep.mubr.msk.f32.mxu0 %vm956_vm1, %v955_v2 }
  0x1d   :  { %893 = vmatpush3.msra.mxu1 %v422_v28  ;;  %884 = vmatmul.mubr.msk.f32.vlgmr.msra.gmra.mxu0 %vm37_vm0, %v342_v29 }
  0x1e   :  { %894 = vmatprep.mubr.msk.f32.mxu1 %vm956_vm1, %v955_v2  ;;  %897 = vmatprep.subr.mxu0 %v955_v2 }
  0x1f   :  { %908 = vmatprep.subr.mxu1 %v955_v2  ;;  %895 = vmatmul.mubr.msk.f32.vlgmr.msra.gmra.mxu1 %vm37_vm0, %v421_v30 }
  0x20   :  { %898 = vmatpush3.msra.mxu0 %v504_v31  ;;  %909 = vmatpush3.msra.mxu1 %v583_v32 }
  0x21   :  { %899 = vmatprep.subr.mxu0 %v955_v2  ;;  %910 = vmatprep.subr.mxu1 %v955_v2 }
  0x22   :  { %900 = vmatpush3.msra.mxu0 %v503_v33  ;;  %911 = vmatpush3.msra.mxu1 %v582_v34 }
  0x23   :  { %901 = vmatprep.subr.mxu0 %v955_v2  ;;  %912 = vmatprep.subr.mxu1 %v955_v2 }
  0x24   :  { %902 = vmatpush3.msra.mxu0 %v502_v35  ;;  %913 = vmatpush3.msra.mxu1 %v581_v36 }
  0x25   :  { %903 = vmatprep.subr.mxu0 %v955_v2  ;;  %914 = vmatprep.subr.mxu1 %v955_v2 }
  0x26   :  { %904 = vmatpush3.msra.mxu0 %v501_v37  ;;  %905 = vmatprep.mubr.msk.f32.mxu0 %vm956_vm1, %v955_v2 }
  0x27   :  { %915 = vmatpush3.msra.mxu1 %v580_v38  ;;  %916 = vmatprep.mubr.msk.f32.mxu1 %vm956_vm1, %v955_v2 }
  0x28   :  { %906 = vmatmul.mubr.msk.f32.vlgmr.msra.gmra.mxu0 %vm37_vm0, %v500_v39  ;;  %917 = vmatmul.mubr.msk.f32.vlgmr.msra.gmra.mxu1 %vm37_vm0, %v579_v40 }
  0x29   :  { %919 = vmatprep.subr.mxu0 %v955_v2  ;;  %927 = vmatprep.mubr.msk.f32.mxu0 %vm956_vm1, %v955_v2 }
  0x2a   :  { %920 = vmatpush3.msra.mxu0 %v678_v41 }
  0x2b   :  { %921 = vmatprep.subr.mxu0 %v955_v2 }
  0x2c   :  { %922 = vmatpush3.msra.mxu0 %v677_v42 }
  0x2d   :  { %923 = vmatprep.subr.mxu0 %v955_v2 }
  0x2e   :  { %924 = vmatpush3.msra.mxu0 %v676_v43 }
  0x2f   :  { %925 = vmatprep.subr.mxu0 %v955_v2 }
  0x30   :  { %926 = vmatpush3.msra.mxu0 %v675_v44 }
  0xc9   :  { %v107_v45 = vpop.f32.mrf.mxu0 }
  0xcb   :  { %v180_v46 = vpop.f32.mrf.mxu1  ;;  %v841_v47 = vpop.f32.mrf.mxu0 }
  0xcc   :  { %v181_v53 = vadd.f32 %v180_v46, %v107_v45 }
  0xcd   :  { %v852_v48 = vpop.f32.mrf.mxu1 }
  0xd3   :  { %v258_v49 = vpop.f32.mrf.mxu0 }
  0xd4   :  { %v262_v54 = vadd.f32 %v258_v49, %v181_v53 }
  0xd5   :  { %v337_v50 = vpop.f32.mrf.mxu1  ;;  %v863_v51 = vpop.f32.mrf.mxu0 }
  0xd6   :  { %v341_v58 = vadd.f32 %v337_v50, %v262_v54 }
  0xd7   :  { %v874_v52 = vpop.f32.mrf.mxu1 }
  0xdd   :  { %v416_v55 = vpop.f32.mrf.mxu0 }
  0xde   :  { %v420_v60 = vadd.f32 %v416_v55, %v341_v58 }
  0xdf   :  { %v495_v56 = vpop.f32.mrf.mxu1  ;;  %v885_v57 = vpop.f32.mrf.mxu0 }
  0xe0   :  { %v499_v61 = vadd.f32 %v495_v56, %v420_v60 }
  0xe1   :  { %v896_v59 = vpop.f32.mrf.mxu1 }
  0xe8   :  { %v574_v62 = vpop.f32.mrf.mxu0  ;;  %v653_v63 = vpop.f32.mrf.mxu1 }
  0xe9   :  { %v578_v0 = vadd.f32 %v574_v62, %v499_v61 }
  0xea   :  { %v907_v2 = vpop.f32.mrf.mxu0  ;;  %v918_v3 = vpop.f32.mrf.mxu1 }
  0xeb   :  { %v657_v4 = vadd.f32 %v653_v63, %v578_v0 }
  0xed   :  { %v659_v5 = vadd.f32 %v658_v1, %v657_v4 }
  0xef   :  { %661 = vst.msk [vmem:[#allocation2] sm:$0x3] %vm25_vm2, %v659_v5 }
  0xf6   :  { %v665_v7 = vld [vmem:[#allocation2] sm:$0x3] }
  0xf7   :  { %v673_v8 = vadd.f32 %v783_v6, %v665_v7 }
  0xf9   :  { %v674_v9 = vmax.f32 %v673_v8, 0.0 }
  0xfb   :  { %928 = vmatmul.mubr.msk.f32.vlgmr.msra.gmra.mxu0 %vm37_vm0, %v674_v9 }
 0x1bb   :  { %v755_v11 = vpop.f32.mrf.mxu0 }
 0x1bc   :  { %v756_v12 = vadd.f32 %v784_v10, %v755_v11 }
 0x1bd   :  { %v929_v13 = vpop.f32.mrf.mxu0 }
 0x1be   :  { %760 = vst.msk [vmem:[#allocation3] sm:$0x3] %vm759_vm3, %v756_v12 }
 0x1bf   :  { %944 = shalt.err (!%p941_p4)
}
 0x1c0   :  { %770 = dma.vmem_to_hbm [thread:$0]  %s768_s8, 32, %s1200_s5, [#allocation4]  }
 0x1c1   :  { %953 = dma.done.wait [#allocation4], 32  }
 0x1c2   :  { %954 = vsyncadd [#allocation4], 4294967264 }
 0x1c3   :  { %774 = vsyncpa [#allocation4], 1 }

</bundles_post_ra>
